<compile_context>
chip_gen: v5e
topology: v5e:2x2
jax: 0.10.0
libtpu: 0.0.40
codegen_flags: <defaults>
</compile_context>

<pallas_src>
import jax
import jax.numpy as jnp
from jax import lax
from jax.experimental import pallas as pl
from jax.experimental.pallas import tpu as pltpu

_LANES = 128
_SUB = 8          # sub-slab rows per fori_loop iteration == sublanes of one f32 vreg
_UNROLL = 8


def _make_kernel(tile_rows, r_valid, needs_mask, unroll):
    steps = tile_rows // _SUB

    def kernel(pred_ref, label_ref, out_ref):
        k = pl.program_id(1)

        # Output block is resident across the reduction axis -> init once per example.
        @pl.when(k == 0)
        def _():
            out_ref[...] = jnp.zeros_like(out_ref)

        if needs_mask:
            # Hoisted out of the loop (JAX does not CSE broadcast_in_dim).
            row_iota = lax.broadcasted_iota(jnp.int32, (_SUB, _LANES), 0)
            tile_base = k * tile_rows

        def body(i, carry):
            acc_i, acc_u = carry
            off = pl.multiple_of(i * _SUB, _SUB)
            p = pred_ref[0, pl.ds(off, _SUB), :].astype(jnp.float32)
            l = label_ref[0, pl.ds(off, _SUB), :].astype(jnp.float32)
            if needs_mask:
                # Rows past the true extent are NOT zero-filled by Pallas; mask them.
                valid = (tile_base + off + row_iota) < r_valid
                p = jnp.where(valid, p, 0.0)
                l = jnp.where(valid, l, 0.0)
            return acc_i + p * l, acc_u + (p * p + l)

        zeros = jnp.zeros((_SUB, _LANES), jnp.float32)
        acc_i, acc_u = lax.fori_loop(0, steps, body, (zeros, zeros), unroll=unroll)

        # Lane-dense accumulation into the output block; no in-kernel cross-lane reduce.
        out_ref[0, 0] += acc_i
        out_ref[0, 1] += acc_u

    return kernel


def _choose_tile_rows(r, max_tr):
    """Tile rows (multiple of 8, <= r). Prefer an exact divisor to skip tail masking."""
    if r <= max_tr:
        return r
    for cand in range(max_tr, max_tr // 2 - 1, -8):
        if r % cand == 0:
            return cand
    return max_tr


def soft_iou_loss(pred, label, *, max_tile_rows=8192):
    """Pallas TPU implementation of soft_iou_loss.forward(pred, label)."""
    assert pred.shape == label.shape
    b = pred.shape[0]
    n = 1
    for d in pred.shape[1:]:
        n *= d

    # Inputs stay in native dtype (kernel casts to f32); flatten per example.
    pred2 = pred.reshape(b, n)
    label2 = label.reshape(b, n)

    n_pad = ((n + _SUB * _LANES - 1) // (_SUB * _LANES)) * (_SUB * _LANES)
    if n_pad != n:
        # TODO(synk): rare path — only lane/sublane-misaligned inputs (n % 1024 != 0)
        # take this one-time zero-pad HBM round trip; aligned inputs never pad.
        pad = n_pad - n
        pred2 = jnp.pad(pred2, ((0, 0), (0, pad)))
        label2 = jnp.pad(label2, ((0, 0), (0, pad)))

    r = n_pad // _LANES                      # rows of the (B, R, 128) view; R % 8 == 0
    pred3 = pred2.reshape(b, r, _LANES)
    label3 = label2.reshape(b, r, _LANES)

    max_tr = max(_SUB, (max_tile_rows // _SUB) * _SUB)
    tr = _choose_tile_rows(r, max_tr)
    needs_mask = (r % tr) != 0               # ragged last row-tile -> mask in-kernel
    grid_k = pl.cdiv(r, tr)
    steps = tr // _SUB
    unroll = max(1, min(_UNROLL, steps))

    kernel = _make_kernel(tr, r, needs_mask, unroll)

    sums = pl.pallas_call(
        kernel,
        out_shape=jax.ShapeDtypeStruct((b, 2, _SUB, _LANES), jnp.float32),
        grid_spec=pltpu.PrefetchScalarGridSpec(
            num_scalar_prefetch=0,
            grid=(b, grid_k),
            in_specs=[
                pl.BlockSpec((1, tr, _LANES), lambda bi, ki: (bi, ki, 0)),
                pl.BlockSpec((1, tr, _LANES), lambda bi, ki: (bi, ki, 0)),
            ],
            out_specs=pl.BlockSpec((1, 2, _SUB, _LANES),
                                   lambda bi, ki: (bi, 0, 0, 0)),
        ),
        compiler_params=pltpu.CompilerParams(
            dimension_semantics=("parallel", "arbitrary"),
            vmem_limit_bytes=40 * 1024 * 1024,
        ),
    )(pred3, label3)

    # Tiny finalize in plain JAX: cross-lane reduce of the (B, 2, 8, 128) partials.
    inter = jnp.sum(sums[:, 0], axis=(1, 2))
    unit = jnp.sum(sums[:, 1], axis=(1, 2)) - inter
    # TODO(synk): for B < 2 on v7x (2 TCs) a size-2 parallel split of the row axis would
    # keep both cores busy; omitted to keep the single-output-block accumulator simple.
    return jnp.mean(1.0 - inter / (unit + 1e-10))


def _reference(pred, label):
    b = pred.shape[0]
    p2 = pred.reshape(b, -1).astype(jnp.float32)
    l2 = label.reshape(b, -1).astype(jnp.float32)
    inter = jnp.sum(p2 * l2, axis=-1)
    unit = jnp.sum(p2 * p2 + l2, axis=-1) - inter
    return jnp.mean(1.0 - inter / (unit + 1e-10))


if __name__ == "__main__":
    key = jax.random.PRNGKey(0)
    k1, k2, k3, k4 = jax.random.split(key, 4)

    ok = True

    # Main check: lane/sublane-aligned shape (no pad, no mask), B=2, C=4, 16x16.
    pred = jax.nn.sigmoid(jax.random.normal(k1, (2, 4, 16, 16), jnp.float32))
    label = (jax.random.uniform(k2, (2, 4, 16, 16)) > 0.5).astype(jnp.float32)
    out = jax.block_until_ready(soft_iou_loss(pred, label))
    ref = _reference(pred, label)
    ok &= bool(jnp.allclose(out, ref, rtol=1e-5, atol=1e-5))

    # Masked-tail path: R=40 rows, forced tile of 32 -> ragged last tile masked in-kernel.
    pred_m = jax.nn.sigmoid(jax.random.normal(k3, (2, 5, 32, 32), jnp.float32))
    label_m = (jax.random.uniform(k4, (2, 5, 32, 32)) > 0.5).astype(jnp.float32)
    out_m = jax.block_until_ready(soft_iou_loss(pred_m, label_m, max_tile_rows=32))
    ref_m = _reference(pred_m, label_m)
    ok &= bool(jnp.allclose(out_m, ref_m, rtol=1e-5, atol=1e-5))

    assert ok, (out, ref, out_m, ref_m)
    print("KERNEL_OK")
</pallas_src>

<mosaic_0001>
module attributes {stable_mosaic.version = 11 : i64} {
  func.func @kernel(%arg0: i32, %arg1: i32, %arg2: memref<1x8x128xf32, #tpu.memory_space<vmem>>, %arg3: memref<1x8x128xf32, #tpu.memory_space<vmem>>, %arg4: memref<1x2x8x128xf32, #tpu.memory_space<vmem>>) attributes {dimension_semantics = [#tpu.dimension_semantics<parallel>, #tpu.dimension_semantics<arbitrary>], iteration_bounds = array<i64: 2, 1>, scalar_prefetch = 0 : i64, scratch_operands = 0 : i64, tpu.core_type = #tpu.core_type<tc>, window_params = [{transform_indices = @transform_0, window_bounds = array<i64: 1, 8, 128>}, {transform_indices = @transform_1, window_bounds = array<i64: 1, 8, 128>}, {transform_indices = @transform_2, window_bounds = array<i64: 1, 2, 8, 128>}]} {
    %c0_i32 = arith.constant 0 : i32
    %0 = arith.cmpi eq, %arg1, %c0_i32 : i32
    %1 = arith.extui %0 : i1 to i32
    %c0_i32_0 = arith.constant 0 : i32
    %2 = arith.cmpi ne, %1, %c0_i32_0 : i32
    scf.if %2 {
      %cst_20 = arith.constant 0.000000e+00 : f32
      %29 = vector.broadcast %cst_20 : f32 to vector<1x2x8x128xf32>
      %c0_21 = arith.constant 0 : index
      %c0_22 = arith.constant 0 : index
      %c0_23 = arith.constant 0 : index
      %c0_24 = arith.constant 0 : index
      %30 = vector.load %arg4[%c0_21, %c0_22, %c0_23, %c0_24] : memref<1x2x8x128xf32, #tpu.memory_space<vmem>>, vector<1x2x8x128xf32>
      tpu.vector_store %arg4[%c0_21, %c0_22, %c0_23, %c0_24], %29 {strides = array<i32>} : memref<1x2x8x128xf32, #tpu.memory_space<vmem>>, vector<1x2x8x128xf32>,
    } else {
    }
    %cst = arith.constant 0.000000e+00 : f32
    %3 = vector.broadcast %cst : f32 to vector<8x128xf32>
    %c0_i32_1 = arith.constant 0 : i32
    %c8_i32 = arith.constant 8 : i32
    %4 = arith.muli %c0_i32_1, %c8_i32 : i32
    %5 = tpu.assume_multiple %4, 8 : i32
    %c0 = arith.constant 0 : index
    %6 = arith.index_cast %5 : i32 to index
    %c0_2 = arith.constant 0 : index
    %7 = vector.load %arg2[%c0, %6, %c0_2] : memref<1x8x128xf32, #tpu.memory_space<vmem>>, vector<1x8x128xf32>
    %8 = vector.shape_cast %7 : vector<1x8x128xf32> to vector<8x128xf32>
    %c0_3 = arith.constant 0 : index
    %9 = arith.index_cast %5 : i32 to index
    %c0_4 = arith.constant 0 : index
    %10 = vector.load %arg3[%c0_3, %9, %c0_4] : memref<1x8x128xf32, #tpu.memory_space<vmem>>, vector<1x8x128xf32>
    %11 = vector.shape_cast %10 : vector<1x8x128xf32> to vector<8x128xf32>
    %12 = arith.mulf %8, %11 : vector<8x128xf32>
    %13 = arith.addf %3, %12 : vector<8x128xf32>
    %14 = arith.mulf %8, %8 : vector<8x128xf32>
    %15 = arith.addf %14, %11 : vector<8x128xf32>
    %16 = arith.addf %3, %15 : vector<8x128xf32>
    %c1_i32 = arith.constant 1 : i32
    %c0_5 = arith.constant 0 : index
    %c0_6 = arith.constant 0 : index
    %c0_7 = arith.constant 0 : index
    %c0_8 = arith.constant 0 : index
    %17 = vector.load %arg4[%c0_5, %c0_6, %c0_7, %c0_8] : memref<1x2x8x128xf32, #tpu.memory_space<vmem>>, vector<1x1x8x128xf32>
    %18 = vector.shape_cast %17 : vector<1x1x8x128xf32> to vector<8x128xf32>
    %19 = arith.addf %18, %13 : vector<8x128xf32>
    %c0_9 = arith.constant 0 : index
    %c0_10 = arith.constant 0 : index
    %c0_11 = arith.constant 0 : index
    %c0_12 = arith.constant 0 : index
    %20 = vector.load %arg4[%c0_9, %c0_10, %c0_11, %c0_12] : memref<1x2x8x128xf32, #tpu.memory_space<vmem>>, vector<1x1x8x128xf32>
    %21 = vector.shape_cast %20 : vector<1x1x8x128xf32> to vector<8x128xf32>
    %22 = vector.shape_cast %19 : vector<8x128xf32> to vector<1x1x8x128xf32>
    tpu.vector_store %arg4[%c0_9, %c0_10, %c0_11, %c0_12], %22 {strides = array<i32>} : memref<1x2x8x128xf32, #tpu.memory_space<vmem>>, vector<1x1x8x128xf32>,
    %c0_13 = arith.constant 0 : index
    %c1 = arith.constant 1 : index
    %c0_14 = arith.constant 0 : index
    %c0_15 = arith.constant 0 : index
    %23 = vector.load %arg4[%c0_13, %c1, %c0_14, %c0_15] : memref<1x2x8x128xf32, #tpu.memory_space<vmem>>, vector<1x1x8x128xf32>
    %24 = vector.shape_cast %23 : vector<1x1x8x128xf32> to vector<8x128xf32>
    %25 = arith.addf %24, %16 : vector<8x128xf32>
    %c0_16 = arith.constant 0 : index
    %c1_17 = arith.constant 1 : index
    %c0_18 = arith.constant 0 : index
    %c0_19 = arith.constant 0 : index
    %26 = vector.load %arg4[%c0_16, %c1_17, %c0_18, %c0_19] : memref<1x2x8x128xf32, #tpu.memory_space<vmem>>, vector<1x1x8x128xf32>
    %27 = vector.shape_cast %26 : vector<1x1x8x128xf32> to vector<8x128xf32>
    %28 = vector.shape_cast %25 : vector<8x128xf32> to vector<1x1x8x128xf32>
    tpu.vector_store %arg4[%c0_16, %c1_17, %c0_18, %c0_19], %28 {strides = array<i32>} : memref<1x2x8x128xf32, #tpu.memory_space<vmem>>, vector<1x1x8x128xf32>,
    return
  }
  func.func @transform_0(%arg0: i32, %arg1: i32) -> (i32, i32, i32) {
    %c0_i32 = arith.constant 0 : i32
    %c0_i32_0 = arith.constant 0 : i32
    return %arg0, %arg1, %c0_i32 : i32, i32, i32
  }
  func.func @transform_1(%arg0: i32, %arg1: i32) -> (i32, i32, i32) {
    %c0_i32 = arith.constant 0 : i32
    %c0_i32_0 = arith.constant 0 : i32
    return %arg0, %arg1, %c0_i32 : i32, i32, i32
  }
  func.func @transform_2(%arg0: i32, %arg1: i32) -> (i32, i32, i32, i32) {
    %c0_i32 = arith.constant 0 : i32
    %c0_i32_0 = arith.constant 0 : i32
    %c0_i32_1 = arith.constant 0 : i32
    %c0_i32_2 = arith.constant 0 : i32
    return %arg0, %c0_i32, %c0_i32_0, %c0_i32_1 : i32, i32, i32, i32
  }
}

</mosaic_0001>

<bundles_post_ra>
// kernel: tpu_custom_call.1
= control target key start
LH: loop header
LB: loop body
LE: loop exit
PB: predicated region body
PF: predicated region fallthrough
CT: control target
= control target key end

     0   :  { %7 = vsyncpa [#allocation3], 0  ;;  %s744_s0 = inlined_call_operand.hbm [shape: f32[2,8,128], index: 0, kind: input, shape index: {}]   ;;  %s745_s1 = inlined_call_operand.hbm [shape: f32[2,8,128], index: 1, kind: input, shape index: {}]   ;;  %s746_s2 = inlined_call_operand.hbm [shape: f32[2,2,8,128], index: 2, kind: output, shape index: {}]  }
   0x1   :  { %9 = vsyncpa [#allocation3 + $0x1], 0 }
   0x2   :  { %10 = vsyncpa [#allocation6], 0 }
   0x3   :  { %12 = vsyncpa [#allocation6 + $0x1], 0 }
   0x4   :  { %13 = vsyncpa [#allocation4], 0 }
   0x5   :  { %15 = vsyncpa [#allocation4 + $0x1], 0  ;;  %s615_s9 = smov 0   ;;  %s617_s10 = smov 0  }
   0x6   :  { %s619_s11 = smov 0   ;;  %s621_s12 = smov 0  }
   0x7   :  { %s623_s13 = smov 0   ;;  %s625_s14 = smov 0  }
   0x8 LB: > { %s360_s15 = sadd.s32 4294967295, %s596_s14   ;;  %s361_s16 = sadd.s32 4294967294, %s596_s14   ;;  %s596_s14 = sphi %s625_s14, %s21_s14   ;;  %s592_s13 = sphi %s623_s13, %s755_s13   ;;  %s588_s12 = sphi %s621_s12, %s754_s12   ;;  %s584_s11 = sphi %s619_s11, %s753_s11   ;;  %s580_s10 = sphi %s617_s10, %s752_s10   ;;  %s576_s9 = sphi %s615_s9, %s751_s9  }
   0x9   : > { %s33_s17 = sadd.s32 1, %s592_s13  ;;  %s42_s18 = sadd.s32 1, %s584_s11 }
   0xa   : > { %p35_p0 = scmp.ge.s32.totalorder %s33_s17, 2  ;;  %p49_p1 = scmp.ne.s32.totalorder %s584_s11, %s580_s10 }
   0xb   : > { %p50_p2 = scmp.eq.s32.totalorder %s596_s14, 0  ;;  %p55_p3 = scmp.ne.s32.totalorder %s580_s10, %s576_s9 }
   0xc   : > { %s757_s17 = smov (%p35_p0, %s33_s17), 0  ;;  %p56_p5 = scmp.eq.s32.totalorder %s360_s15, 0 }
   0xd   : > { %p656_p4 = por %p50_p2, %p49_p1  ;;  %s37_s20 = ssub.s32 %s592_s13, %s757_s17 }
   0xe   : > { %p107_p6 = scmp.eq.s32.totalorder %s360_s15, 1  ;;  %p40_p7 = scmp.eq.s32.totalorder %s37_s20, 0 }
   0xf   : > { %p662_p8 = por %p56_p5, %p55_p3  ;;  %p113_p10 = scmp.eq.s32.totalorder %s361_s16, 1 }
  0x10   : > { %p666_p9 = por %p107_p6, %p49_p1  ;;  %p363_p12 = scmp.ge.s32.totalorder %s596_s14, 2 }
  0x11   : > { %s671_s23 = scalar_select %p40_p7, %s584_s11, %s42_s18  }
  0x12   : > { %p673_p11 = por %p113_p10, %p55_p3  ;;  %p397_p13 = scmp.lt.s32.totalorder %s596_s14, 2 }
  0x13   : > { %s133_s25 = sand.u32 1, %s584_s11   ;;  %s365_s27 = sshll.u32 %s592_s13, 3 }
  0x14   : > { %s364_s26 = sshll.u32 %s133_s25, 3  ;;  %s142_s30 = scalar_lea.hbm %s744_s0, %s365_s27 }
  0x15   : > { %s137_s3 = scalar_lea.vmem [#allocation2], %s364_s26  ;;  %s144_s5 = sshll.u32 %s142_s30, 4  ;;  %s145_s5 = int_to_ptr.hbm [resolvable:$true] %s144_s5 }
  0x16   : > { %s146_s4 = sshll.u32 %s137_s3, 4  ;;  %p387_p0 = pnand %p397_p13, %p656_p4  ;;  %s147_s4 = int_to_ptr.vmem [resolvable:$true] %s146_s4 }
  0x17   : > { %p368_p1 = scmp.ge.s32.totalorder %s596_s14, 1  ;;  %p171_p2 = scmp.lt.s32.totalorder %s596_s14, 3 }
  0x18   : > { %s134_s6 = scalar_lea.sflag [#allocation3], %s133_s25  ;;  %s162_s15 = scalar_lea.hbm %s745_s1, %s365_s27 }
  0x19   : > { %389 = dma.hbm_to_vmem [thread:$0]  (!%p387_p0), %s145_s5, 128, %s147_s4, %s134_s6  }
  0x1a   : > { %p172_p3 = pnand %p368_p1, %p171_p2  ;;  %s157_s16 = scalar_lea.vmem [#allocation5], %s364_s26 }
  0x1b   : > { %s166_s18 = sshll.u32 %s157_s16, 4  ;;  %s164_s20 = sshll.u32 %s162_s15, 4  ;;  %s167_s18 = int_to_ptr.vmem [resolvable:$true] %s166_s18  ;;  %s165_s20 = int_to_ptr.hbm [resolvable:$true] %s164_s20 }
  0x1c   : > { %s154_s28 = scalar_lea.sflag [#allocation6], %s133_s25  ;;  %175 = sbr.rel (%p172_p3) target bundleno = 52 (0x34), region = 28 }
  0x1d   : > { %392 = dma.hbm_to_vmem [thread:$0]  (!%p387_p0), %s165_s20, 128, %s167_s18, %s154_s28  }
  0x1e   : > { %s692_s19 = sand.u32 (!%p172_p3), 1, %s580_s10  }
  0x1f   : > { %s369_s29 = sshll.u32 (!%p172_p3), %s692_s19, 3  ;;  %s178_s30 = scalar_lea.sflag (!%p172_p3), [#allocation3], %s692_s19 }
  0x20   : > { %s181_s3 = scalar_lea.vmem (!%p172_p3), [#allocation2], %s369_s29 }
  0x21   : > { %563 = dma.done.wait (%p662_p8), %s178_s30, 128  }
  0x22   : > { %565 = vsyncadd (%p662_p8), %s178_s30, 4294967168  ;;  %s188_s26 = scalar_lea.sflag [#allocation6], %s692_s19  ;;  %s191_s25 = scalar_lea.vmem [#allocation5], %s369_s29 }
  0x23   : > { %567 = dma.done.wait (%p662_p8), %s188_s26, 128  }
  0x24   : > { %569 = vsyncadd (%p662_p8), %s188_s26, 4294967168  ;;  %s371_s27 = sshll.u32 %s692_s19, 4  ;;  %s379_s4 = sshll.u32 %s588_s12, 4  ;;  %v224_v0 = vld [vmem:[%s181_s3] sm:$0xff]  ;;  %v225_v1 = vld [vmem:[%s191_s25] sm:$0xff] }
  0x25   : > { %s250_s7 = scalar_lea.hbm %s746_s2, %s379_s4  ;;  %v226_v2 = vmul.f32 %v225_v1, %v224_v0  ;;  %v228_v3 = vmul.f32 %v224_v0, %v224_v0  ;;  %s217_s8 = scalar_lea.vmem [#allocation7], %s371_s27 }
  0x26   : > { %s251_s15 = sshll.u32 %s217_s8, 4  ;;  %s253_s16 = sshll.u32 %s250_s7, 4  ;;  %s252_s15 = int_to_ptr.vmem [resolvable:$true] %s251_s15  ;;  %s254_s16 = int_to_ptr.hbm [resolvable:$true] %s253_s16 }
  0x27   : > { %v229_v4 = vadd.f32 %v228_v3, %v225_v1  ;;  %233 = vst [vmem:[%s217_s8] sm:$0xff] %v226_v2  ;;  %s239_s21 = scalar_lea.sflag [#allocation4], %s692_s19  ;;  %s524_s18 = sshra.s32 %s254_s16, 4  ;;  %s525_s18 = int_to_ptr.hbm [resolvable:$true] %s524_s18 }
  0x28   : > { %s526_s12 = scalar_lea.hbm %s525_s18, 16  ;;  %s530_s29 = scalar_lea.hbm %s746_s2, 32 }
  0x29   : > { %373 = vst [vmem:[%s217_s8 + $0x8] sm:$0xff] %v229_v4  ;;  %p527_p4 = scmp.ne.s32.totalorder %s525_s18, %s526_s12  ;;  %p531_p7 = scmp.lt.s32.totalorder %s525_s18, %s746_s2 }
  0x2a   : > { %p532_p8 = scmp.lt.s32.totalorder %s530_s29, %s526_s12 }
  0x2b   : > { %p528_p5 = pnand %p527_p4, %p666_p9 }
  0x2c   : > { %p533_p10 = por %p532_p8, %p531_p7 }
  0x2d   : > { %p529_p6 = pneg %p528_p5 }
  0x2f   : > { %p534_p13 = pnand %p533_p10, %p529_p6 }
  0x31   : > { %537 = shalt.err (!%p534_p13)
}
  0x32   : > { %s598_s19 = smov 128   ;;  %s599_s26 = smov 8  }
  0x33   : > { %384 = dma.vmem_to_hbm [thread:$0]  (%p666_p9), %s252_s15, 256, %s254_s16, %s239_s21, %s598_s19, %s598_s19, %s599_s26  }
  0x34 PF: > { %s268_s25 = sand.u32 1, %s576_s9   ;;  %p394_p0 = pnand %p363_p12, %p673_p11 }
  0x35   : > { %s269_s27 = scalar_lea.sflag [#allocation4], %s268_s25 }
  0x36   : > { %p395_p1 = pneg %p394_p0 }
  0x38   : > { %571 = dma.done.wait (%p395_p1), %s269_s27, 256  }
  0x39   : > { %573 = vsyncadd (%p395_p1), %s269_s27, 4294967040  ;;  %s21_s14 = sadd.s32 1, %s596_s14   ;;  %s751_s9 = smov %s580_s10 }
  0x3a   : > { %p18_p2 = scmp.ge.s32.totalorder %s21_s14, 4   ;;  %s752_s10 = smov %s584_s11 }
  0x3b   : > { %s753_s11 = smov %s671_s23  ;;  %s754_s12 = smov %s592_s13 }
  0x3c   : > { %s755_s13 = smov %s757_s17  ;;  %20 = sbr.rel (!%p18_p2) target bundleno = 8 (0x8), region = 91 }
  0x41   :  { %275 = vsyncpa [#allocation3], 1 }
  0x42   :  { %277 = vsyncpa [#allocation3 + $0x1], 1 }
  0x43   :  { %278 = vsyncpa [#allocation6], 1 }
  0x44   :  { %280 = vsyncpa [#allocation6 + $0x1], 1 }
  0x45   :  { %281 = vsyncpa [#allocation4], 1 }
  0x46   :  { %283 = vsyncpa [#allocation4 + $0x1], 1 }

</bundles_post_ra>
